<compile_context>
chip_gen: v7x
topology: tpu7x:2x2x1
jax: 0.10.0
libtpu: 0.0.40
codegen_flags: <defaults>
</compile_context>

<pallas_src>
from math import log

import jax
import jax.numpy as jnp
from jax.experimental import pallas as pl
from jax.experimental.pallas import tpu as pltpu

_P = 128  # lane width; every layer is computed at this (zero-padded) width


def _generator_kernel(exp_ref, x_ref, w_ref, p_ref, o_ref, v_ref):
    batch = x_ref.shape[0]
    inv_b = 1.0 / batch
    # Ones row for MXU-based batch reductions (hoisted once; reused by every layer).
    ones_row = jnp.ones((1, batch), jnp.float32)

    h = x_ref[...]  # (B, 128) f32, zero-padded past latent_size

    def hidden_block(h, layer, prow):
        w = w_ref[layer * _P:(layer + 1) * _P, :]          # (128,128) bf16, padded entries == 0
        b = p_ref[prow + 0:prow + 1, :]                    # bias  (pad = 0)
        g = p_ref[prow + 1:prow + 2, :]                    # gamma (pad = 1)
        be = p_ref[prow + 2:prow + 3, :]                   # beta  (pad = 0)
        # Linear: bf16 operands -> native MXU path, f32 accumulate.
        y = jnp.dot(h.astype(jnp.bfloat16), w, preferred_element_type=jnp.float32) + b
        # LeakyReLU(0.2): mul+max instead of cmp+select+mul.
        y = jnp.maximum(y, 0.2 * y)
        # BatchNorm1d training mode (biased var, eps=1e-5).  Batch reductions run
        # on the idle MXU (ones-row matmul) instead of XLU sublane-reduce trees;
        # centered variance avoids E[x^2]-E[x]^2 cancellation.
        mean = jnp.dot(ones_row, y, preferred_element_type=jnp.float32) * inv_b
        d = y - mean
        var = jnp.dot(ones_row, d * d, preferred_element_type=jnp.float32) * inv_b
        yhat = d * jax.lax.rsqrt(var + 1e-5)
        return yhat * g + be

    h = hidden_block(h, 0, 0)
    h = hidden_block(h, 1, 3)
    h = hidden_block(h, 2, 6)

    # Last layer: Linear -> ValueExtractor -> Sigmoid -> Softmax(dim=1)
    w4 = w_ref[3 * _P:4 * _P, :]
    b4 = p_ref[9:10, :]
    z = jnp.dot(h.astype(jnp.bfloat16), w4, preferred_element_type=jnp.float32) + b4

    # ValueExtractor: returns its input unchanged; records input.mean(dim=0).
    v_ref[...] = (jnp.dot(ones_row, z, preferred_element_type=jnp.float32) * inv_b
                  ).astype(v_ref.dtype)

    # Sigmoid via a single EUP tanh (no f32 divide on the serial tail).
    s = 0.5 * jnp.tanh(0.5 * z) + 0.5
    # Softmax over dim=1: s in (0,1) -> exp cannot overflow -> no max subtraction
    # needed (shift invariance); denominator via EUP approx reciprocal.
    e = jnp.exp(s)
    sm = e * pl.reciprocal(jnp.sum(e, axis=1, keepdims=True), approx=True)

    img_size = z.shape[1]
    t = sm * 100.0 - (100.0 / img_size)
    # sigmoid(t) ** exp  ==  exp(-exp * log(1 + exp(-t))).
    # t is bounded in (-100/128, 100*e/(127+e) - 100/128] ⊂ (-0.79, 1.31], so
    # exp(-t) ∈ [0.27, 2.2] and the naive log(1+x) is exact; log1p not required here.
    powed = jnp.exp(-exp_ref[0] * jnp.log(1.0 + jnp.exp(-t)))
    o_ref[...] = powed.astype(o_ref.dtype)


def _layer_dims(latent_size, img_size):
    rel_size = int(img_size / latent_size)
    amount_layers = 4
    increase = log(rel_size, amount_layers)
    sizes = [max(round((increase ** l) * latent_size), 1) for l in range(amount_layers)]
    dims = list(zip(sizes[:-1], sizes[1:]))                # hidden layers 1..3
    dims.append((sizes[-1], img_size))                     # last layer -> img_size
    return dims


def init_params(key, latent_size, img_size):
    """Deterministic init mirroring the module's parameter shapes (Linear weights transposed)."""
    dims = _layer_dims(latent_size, img_size)
    params = []
    keys = jax.random.split(key, 2 * len(dims))
    for li, (fan_in, fan_out) in enumerate(dims):
        bound = 1.0 / (fan_in ** 0.5)
        w = jax.random.uniform(keys[2 * li], (fan_in, fan_out),
                               jnp.float32, -bound, bound)       # Linear weight (in, out)
        b = jax.random.uniform(keys[2 * li + 1], (1, fan_out),
                               jnp.float32, -bound, bound)       # Linear bias
        params.append(w)
        params.append(b)
        if li < len(dims) - 1:
            params.append(jnp.ones((1, fan_out), jnp.float32))   # BatchNorm1d gamma
            params.append(jnp.zeros((1, fan_out), jnp.float32))  # BatchNorm1d beta
    return params


def _pack_params(params, dims):
    """Pack all parameters into one bf16 weight slab + one f32 row slab (2 DMAs)."""
    wblocks, prows = [], []
    idx = 0
    for li, (fin, fout) in enumerate(dims):
        assert fin <= _P and fout <= _P
        w, b = params[idx], params[idx + 1]
        idx += 2
        wblocks.append(jnp.zeros((_P, _P), jnp.bfloat16)
                       .at[:fin, :fout].set(w.astype(jnp.bfloat16)))  # pad stays exactly 0
        prows.append(jnp.zeros((1, _P), jnp.float32).at[:, :fout].set(b))     # bias pad 0
        if li < len(dims) - 1:
            g, be = params[idx], params[idx + 1]
            idx += 2
            prows.append(jnp.ones((1, _P), jnp.float32).at[:, :fout].set(g))   # gamma pad 1
            prows.append(jnp.zeros((1, _P), jnp.float32).at[:, :fout].set(be)) # beta pad 0
    wslab = jnp.concatenate(wblocks, axis=0)               # (4*128, 128) bf16
    prow_slab = jnp.concatenate(prows, axis=0)             # (10, 128) f32
    pad = (-prow_slab.shape[0]) % 8
    prow_slab = jnp.pad(prow_slab, ((0, pad), (0, 0)))     # (16, 128), sublane aligned
    return wslab, prow_slab


def generator_forward(x, params, exp_value, latent_size, img_size):
    # Kernel works at a fixed padded width of 128 lanes; the softmax requires the
    # real output width to fill the lanes exactly (lane-dense output store).
    assert img_size == _P, "this fused kernel assumes img_size == 128 (lane-dense output)"
    dims = _layer_dims(latent_size, img_size)
    wslab, prows = _pack_params(params, dims)

    batch = x.shape[0]
    xpad = jnp.pad(x.astype(jnp.float32), ((0, 0), (0, _P - x.shape[1])))
    exp_arr = jnp.reshape(jnp.asarray(exp_value, jnp.float32), (1,))

    vmem = pl.BlockSpec(memory_space=pltpu.MemorySpace.VMEM)
    smem = pl.BlockSpec(memory_space=pltpu.MemorySpace.SMEM)
    out, value = pl.pallas_call(
        _generator_kernel,
        out_shape=(jax.ShapeDtypeStruct((batch, img_size), jnp.float32),   # forward output
                   jax.ShapeDtypeStruct((1, img_size), jnp.float32)),      # ValueExtractor.value
        in_specs=[smem, vmem, vmem, vmem],
        out_specs=(vmem, vmem),
    )(exp_arr, xpad, wslab, prows)
    return out, value


def _reference_forward(x, params, exp_value, dims):
    """Pure-JAX reference (PyTorch semantics); weights rounded to bf16 like the kernel's slab."""
    h = x.astype(jnp.float32)
    idx = 0
    for li, (fin, fout) in enumerate(dims):
        w = params[idx].astype(jnp.bfloat16).astype(jnp.float32)
        b = params[idx + 1]
        idx += 2
        y = h @ w + b
        if li < len(dims) - 1:
            g, be = params[idx], params[idx + 1]
            idx += 2
            y = jnp.where(y >= 0.0, y, 0.2 * y)                       # LeakyReLU(0.2)
            mean = y.mean(axis=0, keepdims=True)
            var = ((y - mean) ** 2).mean(axis=0, keepdims=True)       # biased var
            y = (y - mean) / jnp.sqrt(var + 1e-5) * g + be
        h = y
    z = h
    value = z.mean(axis=0, keepdims=True)                             # ValueExtractor.value
    s = jax.nn.sigmoid(z)
    sm = jax.nn.softmax(s, axis=1)
    t = sm * 100.0 - (100.0 / z.shape[1])
    out = jax.nn.sigmoid(t) ** exp_value
    return out, value


if __name__ == "__main__":
    latent_size, img_size, batch = 8, 128, 64   # layer dims: 8 -> 16 -> 32 -> 64 -> 128
    key = jax.random.PRNGKey(0)
    kx, kp = jax.random.split(key)
    x = jax.random.normal(kx, (batch, latent_size), jnp.float32)
    params = init_params(kp, latent_size, img_size)

    exp_value = 1.0                              # self.exp starts at 1
    fwd = jax.jit(generator_forward, static_argnums=(3, 4))
    out, value = fwd(x, params, exp_value, latent_size, img_size)
    exp_value += 0.01                            # mimic self.exp += 0.01 bookkeeping (host side)

    jax.block_until_ready((out, value))
    assert out.shape == (batch, img_size)
    assert value.shape == (1, img_size)          # ValueExtractor's recorded mean(dim=0)
    assert not bool(jnp.isnan(out).any())
    assert not bool(jnp.isnan(value).any())

    # Loose end-to-end check against the pure-JAX reference (bf16 weights, approx
    # reciprocal and bf16 activation casts are the only differences).
    ref_out, ref_value = _reference_forward(x, params, 1.0, _layer_dims(latent_size, img_size))
    assert bool(jnp.allclose(out, ref_out, atol=5e-2)), float(jnp.max(jnp.abs(out - ref_out)))
    assert bool(jnp.allclose(value, ref_value, atol=2e-1)), float(jnp.max(jnp.abs(value - ref_value)))

    print("KERNEL_OK")
</pallas_src>

<mosaic_0001>
module attributes {stable_mosaic.version = 11 : i64} {
  func.func @_generator_kernel(%arg0: memref<1xf32, #tpu.memory_space<smem>>, %arg1: memref<64x128xf32, #tpu.memory_space<vmem>>, %arg2: memref<512x128xbf16, #tpu.memory_space<vmem>>, %arg3: memref<16x128xf32, #tpu.memory_space<vmem>>, %arg4: memref<64x128xf32, #tpu.memory_space<vmem>>, %arg5: memref<1x128xf32, #tpu.memory_space<vmem>>) attributes {dimension_semantics = [], scalar_prefetch = 0 : i64, scratch_operands = 0 : i64, tpu.core_type = #tpu.core_type<tc>} {
    %cst = arith.constant 1.000000e+00 : f32
    %0 = vector.broadcast %cst : f32 to vector<1x64xf32>
    %c0 = arith.constant 0 : index
    %c0_0 = arith.constant 0 : index
    %1 = vector.load %arg1[%c0, %c0_0] : memref<64x128xf32, #tpu.memory_space<vmem>>, vector<64x128xf32>
    %c0_1 = arith.constant 0 : index
    %c0_2 = arith.constant 0 : index
    %2 = vector.load %arg2[%c0_1, %c0_2] : memref<512x128xbf16, #tpu.memory_space<vmem>>, vector<128x128xbf16>
    %c0_3 = arith.constant 0 : index
    %c0_4 = arith.constant 0 : index
    %3 = vector.load %arg3[%c0_3, %c0_4] : memref<16x128xf32, #tpu.memory_space<vmem>>, vector<1x128xf32>
    %c1 = arith.constant 1 : index
    %c0_5 = arith.constant 0 : index
    %4 = vector.load %arg3[%c1, %c0_5] : memref<16x128xf32, #tpu.memory_space<vmem>>, vector<1x128xf32>
    %c2 = arith.constant 2 : index
    %c0_6 = arith.constant 0 : index
    %5 = vector.load %arg3[%c2, %c0_6] : memref<16x128xf32, #tpu.memory_space<vmem>>, vector<1x128xf32>
    %6 = arith.truncf %1 : vector<64x128xf32> to vector<64x128xbf16>
    %cst_7 = arith.constant dense<0.000000e+00> : vector<64x128xf32>
    %7 = tpu.matmul %6, %2, %cst_7 {dimension_numbers = #tpu.dot_dimension_numbers<[1], [0], [0], [1], [0, 0, 1, 1], [], []>} : vector<64x128xbf16>, vector<128x128xbf16>, vector<64x128xf32> -> vector<64x128xf32>
    %8 = vector.broadcast %3 : vector<1x128xf32> to vector<64x128xf32>
    %9 = arith.addf %7, %8 : vector<64x128xf32>
    %cst_8 = arith.constant 2.000000e-01 : f32
    %10 = vector.broadcast %cst_8 : f32 to vector<64x128xf32>
    %11 = arith.mulf %10, %9 : vector<64x128xf32>
    %12 = arith.maximumf %9, %11 : vector<64x128xf32>
    %cst_9 = arith.constant dense<0.000000e+00> : vector<1x128xf32>
    %13 = tpu.matmul %0, %12, %cst_9 {dimension_numbers = #tpu.dot_dimension_numbers<[1], [0], [0], [1], [0, 0, 1, 1], [], []>} : vector<1x64xf32>, vector<64x128xf32>, vector<1x128xf32> -> vector<1x128xf32>
    %cst_10 = arith.constant 1.562500e-02 : f32
    %14 = vector.broadcast %cst_10 : f32 to vector<1x128xf32>
    %15 = arith.mulf %13, %14 : vector<1x128xf32>
    %16 = vector.broadcast %15 : vector<1x128xf32> to vector<64x128xf32>
    %17 = arith.subf %12, %16 : vector<64x128xf32>
    %18 = arith.mulf %17, %17 : vector<64x128xf32>
    %cst_11 = arith.constant dense<0.000000e+00> : vector<1x128xf32>
    %19 = tpu.matmul %0, %18, %cst_11 {dimension_numbers = #tpu.dot_dimension_numbers<[1], [0], [0], [1], [0, 0, 1, 1], [], []>} : vector<1x64xf32>, vector<64x128xf32>, vector<1x128xf32> -> vector<1x128xf32>
    %cst_12 = arith.constant 1.562500e-02 : f32
    %20 = vector.broadcast %cst_12 : f32 to vector<1x128xf32>
    %21 = arith.mulf %19, %20 : vector<1x128xf32>
    %cst_13 = arith.constant 9.99999974E-6 : f32
    %22 = vector.broadcast %cst_13 : f32 to vector<1x128xf32>
    %23 = arith.addf %21, %22 : vector<1x128xf32>
    %24 = math.rsqrt %23 : vector<1x128xf32>
    %25 = vector.broadcast %24 : vector<1x128xf32> to vector<64x128xf32>
    %26 = arith.mulf %17, %25 : vector<64x128xf32>
    %27 = vector.broadcast %4 : vector<1x128xf32> to vector<64x128xf32>
    %28 = arith.mulf %26, %27 : vector<64x128xf32>
    %29 = vector.broadcast %5 : vector<1x128xf32> to vector<64x128xf32>
    %30 = arith.addf %28, %29 : vector<64x128xf32>
    %c128 = arith.constant 128 : index
    %c0_14 = arith.constant 0 : index
    %31 = vector.load %arg2[%c128, %c0_14] : memref<512x128xbf16, #tpu.memory_space<vmem>>, vector<128x128xbf16>
    %c3 = arith.constant 3 : index
    %c0_15 = arith.constant 0 : index
    %32 = vector.load %arg3[%c3, %c0_15] : memref<16x128xf32, #tpu.memory_space<vmem>>, vector<1x128xf32>
    %c4 = arith.constant 4 : index
    %c0_16 = arith.constant 0 : index
    %33 = vector.load %arg3[%c4, %c0_16] : memref<16x128xf32, #tpu.memory_space<vmem>>, vector<1x128xf32>
    %c5 = arith.constant 5 : index
    %c0_17 = arith.constant 0 : index
    %34 = vector.load %arg3[%c5, %c0_17] : memref<16x128xf32, #tpu.memory_space<vmem>>, vector<1x128xf32>
    %35 = arith.truncf %30 : vector<64x128xf32> to vector<64x128xbf16>
    %cst_18 = arith.constant dense<0.000000e+00> : vector<64x128xf32>
    %36 = tpu.matmul %35, %31, %cst_18 {dimension_numbers = #tpu.dot_dimension_numbers<[1], [0], [0], [1], [0, 0, 1, 1], [], []>} : vector<64x128xbf16>, vector<128x128xbf16>, vector<64x128xf32> -> vector<64x128xf32>
    %37 = vector.broadcast %32 : vector<1x128xf32> to vector<64x128xf32>
    %38 = arith.addf %36, %37 : vector<64x128xf32>
    %cst_19 = arith.constant 2.000000e-01 : f32
    %39 = vector.broadcast %cst_19 : f32 to vector<64x128xf32>
    %40 = arith.mulf %39, %38 : vector<64x128xf32>
    %41 = arith.maximumf %38, %40 : vector<64x128xf32>
    %cst_20 = arith.constant dense<0.000000e+00> : vector<1x128xf32>
    %42 = tpu.matmul %0, %41, %cst_20 {dimension_numbers = #tpu.dot_dimension_numbers<[1], [0], [0], [1], [0, 0, 1, 1], [], []>} : vector<1x64xf32>, vector<64x128xf32>, vector<1x128xf32> -> vector<1x128xf32>
    %cst_21 = arith.constant 1.562500e-02 : f32
    %43 = vector.broadcast %cst_21 : f32 to vector<1x128xf32>
    %44 = arith.mulf %42, %43 : vector<1x128xf32>
    %45 = vector.broadcast %44 : vector<1x128xf32> to vector<64x128xf32>
    %46 = arith.subf %41, %45 : vector<64x128xf32>
    %47 = arith.mulf %46, %46 : vector<64x128xf32>
    %cst_22 = arith.constant dense<0.000000e+00> : vector<1x128xf32>
    %48 = tpu.matmul %0, %47, %cst_22 {dimension_numbers = #tpu.dot_dimension_numbers<[1], [0], [0], [1], [0, 0, 1, 1], [], []>} : vector<1x64xf32>, vector<64x128xf32>, vector<1x128xf32> -> vector<1x128xf32>
    %cst_23 = arith.constant 1.562500e-02 : f32
    %49 = vector.broadcast %cst_23 : f32 to vector<1x128xf32>
    %50 = arith.mulf %48, %49 : vector<1x128xf32>
    %cst_24 = arith.constant 9.99999974E-6 : f32
    %51 = vector.broadcast %cst_24 : f32 to vector<1x128xf32>
    %52 = arith.addf %50, %51 : vector<1x128xf32>
    %53 = math.rsqrt %52 : vector<1x128xf32>
    %54 = vector.broadcast %53 : vector<1x128xf32> to vector<64x128xf32>
    %55 = arith.mulf %46, %54 : vector<64x128xf32>
    %56 = vector.broadcast %33 : vector<1x128xf32> to vector<64x128xf32>
    %57 = arith.mulf %55, %56 : vector<64x128xf32>
    %58 = vector.broadcast %34 : vector<1x128xf32> to vector<64x128xf32>
    %59 = arith.addf %57, %58 : vector<64x128xf32>
    %c256 = arith.constant 256 : index
    %c0_25 = arith.constant 0 : index
    %60 = vector.load %arg2[%c256, %c0_25] : memref<512x128xbf16, #tpu.memory_space<vmem>>, vector<128x128xbf16>
    %c6 = arith.constant 6 : index
    %c0_26 = arith.constant 0 : index
    %61 = vector.load %arg3[%c6, %c0_26] : memref<16x128xf32, #tpu.memory_space<vmem>>, vector<1x128xf32>
    %c7 = arith.constant 7 : index
    %c0_27 = arith.constant 0 : index
    %62 = vector.load %arg3[%c7, %c0_27] : memref<16x128xf32, #tpu.memory_space<vmem>>, vector<1x128xf32>
    %c8 = arith.constant 8 : index
    %c0_28 = arith.constant 0 : index
    %63 = vector.load %arg3[%c8, %c0_28] : memref<16x128xf32, #tpu.memory_space<vmem>>, vector<1x128xf32>
    %64 = arith.truncf %59 : vector<64x128xf32> to vector<64x128xbf16>
    %cst_29 = arith.constant dense<0.000000e+00> : vector<64x128xf32>
    %65 = tpu.matmul %64, %60, %cst_29 {dimension_numbers = #tpu.dot_dimension_numbers<[1], [0], [0], [1], [0, 0, 1, 1], [], []>} : vector<64x128xbf16>, vector<128x128xbf16>, vector<64x128xf32> -> vector<64x128xf32>
    %66 = vector.broadcast %61 : vector<1x128xf32> to vector<64x128xf32>
    %67 = arith.addf %65, %66 : vector<64x128xf32>
    %cst_30 = arith.constant 2.000000e-01 : f32
    %68 = vector.broadcast %cst_30 : f32 to vector<64x128xf32>
    %69 = arith.mulf %68, %67 : vector<64x128xf32>
    %70 = arith.maximumf %67, %69 : vector<64x128xf32>
    %cst_31 = arith.constant dense<0.000000e+00> : vector<1x128xf32>
    %71 = tpu.matmul %0, %70, %cst_31 {dimension_numbers = #tpu.dot_dimension_numbers<[1], [0], [0], [1], [0, 0, 1, 1], [], []>} : vector<1x64xf32>, vector<64x128xf32>, vector<1x128xf32> -> vector<1x128xf32>
    %cst_32 = arith.constant 1.562500e-02 : f32
    %72 = vector.broadcast %cst_32 : f32 to vector<1x128xf32>
    %73 = arith.mulf %71, %72 : vector<1x128xf32>
    %74 = vector.broadcast %73 : vector<1x128xf32> to vector<64x128xf32>
    %75 = arith.subf %70, %74 : vector<64x128xf32>
    %76 = arith.mulf %75, %75 : vector<64x128xf32>
    %cst_33 = arith.constant dense<0.000000e+00> : vector<1x128xf32>
    %77 = tpu.matmul %0, %76, %cst_33 {dimension_numbers = #tpu.dot_dimension_numbers<[1], [0], [0], [1], [0, 0, 1, 1], [], []>} : vector<1x64xf32>, vector<64x128xf32>, vector<1x128xf32> -> vector<1x128xf32>
    %cst_34 = arith.constant 1.562500e-02 : f32
    %78 = vector.broadcast %cst_34 : f32 to vector<1x128xf32>
    %79 = arith.mulf %77, %78 : vector<1x128xf32>
    %cst_35 = arith.constant 9.99999974E-6 : f32
    %80 = vector.broadcast %cst_35 : f32 to vector<1x128xf32>
    %81 = arith.addf %79, %80 : vector<1x128xf32>
    %82 = math.rsqrt %81 : vector<1x128xf32>
    %83 = vector.broadcast %82 : vector<1x128xf32> to vector<64x128xf32>
    %84 = arith.mulf %75, %83 : vector<64x128xf32>
    %85 = vector.broadcast %62 : vector<1x128xf32> to vector<64x128xf32>
    %86 = arith.mulf %84, %85 : vector<64x128xf32>
    %87 = vector.broadcast %63 : vector<1x128xf32> to vector<64x128xf32>
    %88 = arith.addf %86, %87 : vector<64x128xf32>
    %c384 = arith.constant 384 : index
    %c0_36 = arith.constant 0 : index
    %89 = vector.load %arg2[%c384, %c0_36] : memref<512x128xbf16, #tpu.memory_space<vmem>>, vector<128x128xbf16>
    %c9 = arith.constant 9 : index
    %c0_37 = arith.constant 0 : index
    %90 = vector.load %arg3[%c9, %c0_37] : memref<16x128xf32, #tpu.memory_space<vmem>>, vector<1x128xf32>
    %91 = arith.truncf %88 : vector<64x128xf32> to vector<64x128xbf16>
    %cst_38 = arith.constant dense<0.000000e+00> : vector<64x128xf32>
    %92 = tpu.matmul %91, %89, %cst_38 {dimension_numbers = #tpu.dot_dimension_numbers<[1], [0], [0], [1], [0, 0, 1, 1], [], []>} : vector<64x128xbf16>, vector<128x128xbf16>, vector<64x128xf32> -> vector<64x128xf32>
    %93 = vector.broadcast %90 : vector<1x128xf32> to vector<64x128xf32>
    %94 = arith.addf %92, %93 : vector<64x128xf32>
    %cst_39 = arith.constant dense<0.000000e+00> : vector<1x128xf32>
    %95 = tpu.matmul %0, %94, %cst_39 {dimension_numbers = #tpu.dot_dimension_numbers<[1], [0], [0], [1], [0, 0, 1, 1], [], []>} : vector<1x64xf32>, vector<64x128xf32>, vector<1x128xf32> -> vector<1x128xf32>
    %cst_40 = arith.constant 1.562500e-02 : f32
    %96 = vector.broadcast %cst_40 : f32 to vector<1x128xf32>
    %97 = arith.mulf %95, %96 : vector<1x128xf32>
    %c0_41 = arith.constant 0 : index
    %c0_42 = arith.constant 0 : index
    %98 = vector.load %arg5[%c0_41, %c0_42] : memref<1x128xf32, #tpu.memory_space<vmem>>, vector<1x128xf32>
    tpu.vector_store %arg5[%c0_41, %c0_42], %97 {strides = array<i32>} : memref<1x128xf32, #tpu.memory_space<vmem>>, vector<1x128xf32>,
    %cst_43 = arith.constant 5.000000e-01 : f32
    %99 = vector.broadcast %cst_43 : f32 to vector<64x128xf32>
    %100 = arith.mulf %99, %94 : vector<64x128xf32>
    %101 = math.tanh %100 : vector<64x128xf32>
    %cst_44 = arith.constant 5.000000e-01 : f32
    %102 = vector.broadcast %cst_44 : f32 to vector<64x128xf32>
    %103 = arith.mulf %102, %101 : vector<64x128xf32>
    %cst_45 = arith.constant 5.000000e-01 : f32
    %104 = vector.broadcast %cst_45 : f32 to vector<64x128xf32>
    %105 = arith.addf %103, %104 : vector<64x128xf32>
    %106 = math.exp %105 : vector<64x128xf32>
    %cst_46 = arith.constant dense<0.000000e+00> : vector<64xf32>
    %107 = vector.multi_reduction <add>, %106, %cst_46 [1] : vector<64x128xf32> to vector<64xf32>
    %108 = vector.shape_cast %107 : vector<64xf32> to vector<64x1xf32>
    %109 = tpu.reciprocal %108 {approx = true} : vector<64x1xf32> -> vector<64x1xf32>
    %110 = vector.broadcast %109 : vector<64x1xf32> to vector<64x128xf32>
    %111 = arith.mulf %106, %110 : vector<64x128xf32>
    %cst_47 = arith.constant 1.000000e+02 : f32
    %112 = vector.broadcast %cst_47 : f32 to vector<64x128xf32>
    %113 = arith.mulf %111, %112 : vector<64x128xf32>
    %cst_48 = arith.constant 7.812500e-01 : f32
    %114 = vector.broadcast %cst_48 : f32 to vector<64x128xf32>
    %115 = arith.subf %113, %114 : vector<64x128xf32>
    %c0_49 = arith.constant 0 : index
    %116 = memref.load %arg0[%c0_49] : memref<1xf32, #tpu.memory_space<smem>>
    %cst_50 = arith.constant 0.000000e+00 : f32
    %117 = arith.subf %cst_50, %116 : f32
    %cst_51 = arith.constant 0.000000e+00 : f32
    %118 = vector.broadcast %cst_51 : f32 to vector<64x128xf32>
    %119 = arith.subf %118, %115 : vector<64x128xf32>
    %120 = math.exp %119 : vector<64x128xf32>
    %cst_52 = arith.constant 1.000000e+00 : f32
    %121 = vector.broadcast %cst_52 : f32 to vector<64x128xf32>
    %122 = arith.addf %121, %120 : vector<64x128xf32>
    %123 = math.log %122 : vector<64x128xf32>
    %124 = vector.broadcast %117 : f32 to vector<64x128xf32>
    %125 = arith.mulf %124, %123 : vector<64x128xf32>
    %126 = math.exp %125 : vector<64x128xf32>
    %c0_53 = arith.constant 0 : index
    %c0_54 = arith.constant 0 : index
    %127 = vector.load %arg4[%c0_53, %c0_54] : memref<64x128xf32, #tpu.memory_space<vmem>>, vector<64x128xf32>
    tpu.vector_store %arg4[%c0_53, %c0_54], %126 {strides = array<i32>} : memref<64x128xf32, #tpu.memory_space<vmem>>, vector<64x128xf32>,
    return
  }
}

</mosaic_0001>

<bundles_post_ra>
// kernel: generator_forward.1
= control target key start
LH: loop header
LB: loop body
LE: loop exit
PB: predicated region body
PF: predicated region fallthrough
CT: control target
= control target key end

     0   :  { %12 = vsyncpa [#allocation4], 0  ;;  %s2472_s0 = inlined_call_operand.<no memory space> [shape: f32[1], index: 0, kind: input, shape index: {}]   ;;  %s2473_s1 = inlined_call_operand.vmem [shape: f32[64,128], index: 1, kind: input, shape index: {}]   ;;  %s2474_s2 = inlined_call_operand.vmem [shape: bf16[512,128], index: 2, kind: input, shape index: {}]   ;;  %s2475_s3 = inlined_call_operand.vmem [shape: f32[16,128], index: 3, kind: input, shape index: {}]   ;;  %s2476_s4 = inlined_call_operand.hbm [shape: f32[64,128], index: 4, kind: output, shape index: {0}]   ;;  %s2477_s5 = inlined_call_operand.hbm [shape: f32[1,128], index: 5, kind: output, shape index: {1}]  }
   0x1   :  { %v2011_v0 = vld [vmem:[%s2474_s2] sm:$0xff]   ;;  %v2012_v1 = vld [vmem:[%s2474_s2 + $0x8] sm:$0xff]   ;;  %v2013_v2 = vld [vmem:[%s2474_s2 + $0x10] sm:$0xff]  }
   0x2   :  { %1690 = vmatprep.subr.bf16.mxu0 %v2011_v0  ;;  %v2014_v3 = vld [vmem:[%s2474_s2 + $0x18] sm:$0xff]   ;;  %v23_v4 = vld [vmem:[%s2473_s1] sm:$0xff]  ;;  %v24_v5 = vld [vmem:[%s2473_s1 + $0x8] sm:$0xff] }
   0x3   :  { %1691 = vmatpush3.bf16.msra.mxu0 %v2011_v0  ;;  %v50_v6 = vpack.c.bf16 %v24_v5, %v23_v4  ;;  %v2015_v7 = vld [vmem:[%s2474_s2 + $0x20] sm:$0xff]   ;;  %v2016_v8 = vld [vmem:[%s2474_s2 + $0x28] sm:$0xff]   ;;  %v2017_v9 = vld [vmem:[%s2474_s2 + $0x30] sm:$0xff]  }
   0x4   :  { %1692 = vmatprep.subr.bf16.mxu0 %v2012_v1  ;;  %v2018_v10 = vld [vmem:[%s2474_s2 + $0x38] sm:$0xff]  }
   0x5   :  { %1706 = vmatprep.mubr.bf16.mxu0 %v50_v6 }
   0x7   :  { %1693 = vmatpush3.bf16.msra.mxu0 %v2012_v1 }
   0x8   :  { %1694 = vmatprep.subr.bf16.mxu0 %v2013_v2 }
   0xb   :  { %1695 = vmatpush3.bf16.msra.mxu0 %v2013_v2 }
   0xc   :  { %1696 = vmatprep.subr.bf16.mxu0 %v2014_v3 }
   0xf   :  { %1697 = vmatpush3.bf16.msra.mxu0 %v2014_v3 }
  0x10   :  { %1698 = vmatprep.subr.bf16.mxu0 %v2015_v7 }
  0x13   :  { %1699 = vmatpush3.bf16.msra.mxu0 %v2015_v7 }
  0x14   :  { %1700 = vmatprep.subr.bf16.mxu0 %v2016_v8 }
  0x17   :  { %1701 = vmatpush3.bf16.msra.mxu0 %v2016_v8 }
  0x18   :  { %1702 = vmatprep.subr.bf16.mxu0 %v2017_v9 }
  0x19   :  { %13 = vsyncpa [#allocation6], 0  ;;  %v25_v11 = vld [vmem:[%s2473_s1 + $0x10] sm:$0xff]  ;;  %v26_v12 = vld [vmem:[%s2473_s1 + $0x18] sm:$0xff]  ;;  %v2193_v20 = vmov 0.0|0.0   ;;  %vm2194_vm0 = vmmov 0   ;;  %v262_v62 = vlaneseq }
  0x1a   :  { %v27_v13 = vld [vmem:[%s2473_s1 + $0x20] sm:$0xff]  ;;  %v28_v14 = vld [vmem:[%s2473_s1 + $0x28] sm:$0xff]  ;;  %v51_v15 = vpack.c.bf16 %v26_v12, %v25_v11  ;;  %v29_v17 = vld [vmem:[%s2473_s1 + $0x30] sm:$0xff]  ;;  %1919 = vmatprep.subr.bf16.mxu1 %v2193_v20  ;;  %v2195_v21 = vmov 0.0   ;;  %vm187_vm1 = vcmask 523264   ;;  %v2196_v59 = vmov 1.0  }
  0x1b   :  { %1703 = vmatpush3.bf16.msra.mxu0 %v2017_v9  ;;  %v52_v16 = vpack.c.bf16 %v28_v14, %v27_v13  ;;  %v30_v18 = vld [vmem:[%s2473_s1 + $0x38] sm:$0xff]  ;;  %1730 = vmatprep.mubr.msk.f32.mxu1 %vm2194_vm0, %v2195_v21  ;;  %v1522_v22 = vld [vmem:[%s2475_s3] ss:$0 sm:$0xff]  ;;  %v2020_v61 = vld [vmem:[%s2474_s2 + $0x48] sm:$0xff]   ;;  %v263_v63 = vshrl.u32 %v262_v62, 7  ;;  %s1410_s15 = ssub.f32 0.0, %s2472_s0 }
  0x1c   :  { %1704 = vmatprep.subr.bf16.mxu0 %v2018_v10  ;;  %v53_v19 = vpack.c.bf16 %v30_v18, %v29_v17  ;;  %v2019_v60 = vld [vmem:[%s2474_s2 + $0x40] sm:$0xff]   ;;  %s2197_s0 = smov [#allocation5]  }
  0x1d   :  { %v2299_v0 = vsub.s32 0, %v263_v63  ;;  %s1510_s16 = sshll.u32 %s2197_s0, 4  ;;  %s1511_s16 = int_to_ptr.vmem [resolvable:$true] %s1510_s16 }
  0x1e   :  { %s2145_s17 = scalar_lea.vmem %s1511_s16, 16  ;;  %s2149_s18 = scalar_lea.vmem %s1511_s16, 32 }
  0x1f   :  { %1705 = vmatpush3.bf16.msra.mxu0 %v2018_v10  ;;  %p2146_p0 = scmp.ne.s32.totalorder %s1511_s16, %s2145_s17  ;;  %p2150_p1 = scmp.lt.s32.totalorder %s1511_s16, %s1511_s16 }
  0x20   :  { %1752 = vmatprep.subr.bf16.mxu0 %v2019_v60  ;;  %p2151_p2 = scmp.lt.s32.totalorder %s2149_s18, %s2145_s17 }
  0x22   :  { %1707 = vmatmul.mubr.bf16.vlgmr.msra.gmra.mrb[0].mxu0 %v51_v15  ;;  %p2152_p3 = por %p2151_p2, %p2150_p1 }
  0x23   :  { %1710 = vmatprep.mubr.bf16.mxu0 %v52_v16  ;;  %1753 = vmatpush3.bf16.msra.mxu0 %v2019_v60 }
  0x24   :  { %1754 = vmatprep.subr.bf16.mxu0 %v2020_v61  ;;  %p2153_p4 = pnand %p2152_p3, %p2146_p0 }
  0x27   :  { %1755 = vmatpush3.bf16.msra.mxu0 %v2020_v61 }
  0x2a   :  { %1711 = vmatmul.mubr.bf16.gmra.mrb[4].mxu0 %v53_v19 }
  0xf5   :  { %v1708_v23 = vpop.f32.mrb[0].mxu0 }
  0xf6   :  { %v140_v24 = vpop.f32.mrb[1].mxu0  ;;  %v149_v29 = vadd.f32 %v1708_v23, %v1522_v22 }
  0xf7   :  { %v141_v25 = vadd.f32 %v1522_v22, %v140_v24  ;;  %v1709_v26 = vpop.f32.mrb[2].mxu0 }
  0xf8   :  { %v152_v27 = vadd.f32 %v1709_v26, %v1522_v22  ;;  %v143_v28 = vpop.f32.mrb[3].mxu0  ;;  %v173_v34 = vmul.f32 0.2, %v149_v29 }
  0xf9   :  { %v171_v30 = vmul.f32 0.2, %v141_v25  ;;  %v144_v31 = vadd.f32 %v1522_v22, %v143_v28  ;;  %v2022_v28 = vld [vmem:[%s2474_s2 + $0x58] sm:$0xff]  }
  0xfa   :  { %v174_v32 = vmul.f32 0.2, %v152_v27  ;;  %v181_v45 = vmax.f32 %v149_v29, %v173_v34  ;;  %v2023_v29 = vld [vmem:[%s2474_s2 + $0x60] sm:$0xff]  }
  0xfb   :  { %v172_v33 = vmul.f32 0.2, %v144_v31  ;;  %v179_v35 = vmax.f32 %v141_v25, %v171_v30  ;;  %v2024_v30 = vld [vmem:[%s2474_s2 + $0x68] sm:$0xff]  }
  0xfc   :  { %v182_v39 = vmax.f32 %v152_v27, %v174_v32  ;;  %v2021_v27 = vld [vmem:[%s2474_s2 + $0x50] sm:$0xff]   ;;  %v2026_v32 = vld [vmem:[%s2474_s2 + $0x78] sm:$0xff]  }
  0xfd   :  { %v180_v36 = vmax.f32 %v144_v31, %v172_v33  ;;  %v1712_v37 = vpop.f32.mrb[4].mxu0  ;;  %1756 = vmatprep.subr.bf16.mxu0 %v2021_v27  ;;  %v2025_v31 = vld [vmem:[%s2474_s2 + $0x70] sm:$0xff]  }
  0xfe   :  { %v156_v38 = vpop.f32.mrb[5].mxu0  ;;  %v165_v46 = vadd.f32 %v1712_v37, %v1522_v22  ;;  %v1923_v51 = vpack.c.bf16 %v182_v39, %v181_v45  ;;  %1757 = vmatpush3.bf16.msra.mxu0 %v2021_v27 }
  0xff   :  { %v157_v40 = vadd.f32 %v1522_v22, %v156_v38  ;;  %v1713_v41 = vpop.f32.mrb[6].mxu0  ;;  %v1920_v42 = vpack.c.bf16 %v180_v36, %v179_v35  ;;  %1758 = vmatprep.subr.bf16.mxu0 %v2022_v28 }
 0x100   :  { %v168_v43 = vadd.f32 %v1713_v41, %v1522_v22  ;;  %v159_v44 = vpop.f32.mrb[7].mxu0  ;;  %v177_v52 = vmul.f32 0.2, %v165_v46 }
 0x101   :  { %v175_v47 = vmul.f32 0.2, %v157_v40  ;;  %v160_v48 = vadd.f32 %v1522_v22, %v159_v44  ;;  %1921 = vmatpush3.bf16.msra.mxu1 %v1920_v42  ;;  %v1534_v44 = vld [vmem:[%s2475_s3 + $0x2] ss:$0 sm:$0xff] }
 0x102   :  { %1922 = vmatprep.subr.bf16.mxu1 %v2193_v20  ;;  %v178_v49 = vmul.f32 0.2, %v168_v43  ;;  %v185_v57 = vmax.f32 %v165_v46, %v177_v52  ;;  %1759 = vmatpush3.bf16.msra.mxu0 %v2022_v28 }
 0x103   :  { %v176_v50 = vmul.f32 0.2, %v160_v48  ;;  %v183_v53 = vmax.f32 %v157_v40, %v175_v47  ;;  %1760 = vmatprep.subr.bf16.mxu0 %v2023_v29 }
 0x104   :  { %v186_v55 = vmax.f32 %v168_v43, %v178_v49 }
 0x105   :  { %v184_v54 = vmax.f32 %v160_v48, %v176_v50  ;;  %1924 = vmatpush3.bf16.msra.mxu1 %v1923_v51 }
 0x106   :  { %1925 = vmatprep.subr.bf16.mxu1 %v2193_v20  ;;  %v1929_v58 = vpack.c.bf16 %v186_v55, %v185_v57  ;;  %1761 = vmatpush3.bf16.msra.mxu0 %v2023_v29 }
 0x107   :  { %v1926_v56 = vpack.c.bf16 %v184_v54, %v183_v53  ;;  %1762 = vmatprep.subr.bf16.mxu0 %v2024_v30 }
 0x109   :  { %1927 = vmatpush3.bf16.msra.mxu1 %v1926_v56 }
 0x10a   :  { %1928 = vmatprep.subr.bf16.mxu1 %v2193_v20  ;;  %1763 = vmatpush3.bf16.msra.mxu0 %v2024_v30 }
 0x10b   :  { %1764 = vmatprep.subr.bf16.mxu0 %v2025_v31 }
 0x10d   :  { %1930 = vmatpush3.bf16.msra.mxu1 %v1929_v58 }
 0x10e   :  { %1931 = vmatprep.subr.bf16.mxu1 %v2193_v20  ;;  %1765 = vmatpush3.bf16.msra.mxu0 %v2025_v31 }
 0x10f   :  { %1766 = vmatprep.subr.bf16.mxu0 %v2026_v32 }
 0x110   :  { %1731 = vmatmul.mubr.msk.f32.vlgmr.msra.gmra.mrb[0].mxu1 %vm187_vm1, %v2196_v59 }
 0x111   :  { %1749 = vmatprep.mubr.msk.f32.mxu1 %vm2194_vm0, %v2195_v21 }
 0x112   :  { %1767 = vmatpush3.bf16.msra.mxu0 %v2026_v32 }
 0x1e3   :  { %v257_v1 = vpop.f32.mrb[0].mxu1 }
 0x1e4   :  { %v261_v2 = vmul.f32 0.015625, %v257_v1  ;;  %v1732_v3 = vpop.f32.mrb[1].mxu1 }
 0x1e6   :  { %v265_v4 = vrot.slane %v261_v2, %v2299_v0 }
 0x1e8   :  { %v266_v5 = vsub.f32 %v179_v35, %v265_v4  ;;  %v267_v6 = vsub.f32 %v180_v36, %v265_v4  ;;  %v268_v7 = vsub.f32 %v181_v45, %v265_v4  ;;  %v269_v8 = vsub.f32 %v182_v39, %v265_v4  ;;  %v1533_v39 = vld [vmem:[%s2475_s3 + $0x1] ss:$0 sm:$0xff] }
 0x1e9   :  { %v270_v11 = vsub.f32 %v183_v53, %v265_v4  ;;  %v271_v15 = vsub.f32 %v184_v54, %v265_v4  ;;  %v272_v16 = vsub.f32 %v185_v57, %v265_v4  ;;  %v273_v22 = vsub.f32 %v186_v55, %v265_v4 }
 0x1ea   :  { %v274_v9 = vmul.f32 %v266_v5, %v266_v5  ;;  %v275_v10 = vmul.f32 %v267_v6, %v267_v6  ;;  %v276_v13 = vmul.f32 %v268_v7, %v268_v7  ;;  %v277_v14 = vmul.f32 %v269_v8, %v269_v8 }
 0x1eb   :  { %v278_v18 = vmul.f32 %v270_v11, %v270_v11  ;;  %v279_v19 = vmul.f32 %v271_v15, %v271_v15  ;;  %v280_v24 = vmul.f32 %v272_v16, %v272_v16  ;;  %v281_v25 = vmul.f32 %v273_v22, %v273_v22 }
 0x1ec   :  { %v1932_v12 = vpack.c.bf16 %v275_v10, %v274_v9  ;;  %v1935_v17 = vpack.c.bf16 %v277_v14, %v276_v13 }
 0x1ed   :  { %v1938_v23 = vpack.c.bf16 %v279_v19, %v278_v18  ;;  %v1941_v26 = vpack.c.bf16 %v281_v25, %v280_v24 }
 0x1ee   :  { %1933 = vmatpush3.bf16.msra.mxu1 %v1932_v12 }
 0x1ef   :  { %1934 = vmatprep.subr.bf16.mxu1 %v2193_v20 }
 0x1f2   :  { %1936 = vmatpush3.bf16.msra.mxu1 %v1935_v17 }
 0x1f3   :  { %1937 = vmatprep.subr.bf16.mxu1 %v2193_v20 }
 0x1f6   :  { %1939 = vmatpush3.bf16.msra.mxu1 %v1938_v23 }
 0x1f7   :  { %1940 = vmatprep.subr.bf16.mxu1 %v2193_v20 }
 0x1fa   :  { %1942 = vmatpush3.bf16.msra.mxu1 %v1941_v26 }
 0x1fb   :  { %1943 = vmatprep.subr.bf16.mxu1 %v2193_v20 }
 0x1fd   :  { %1750 = vmatmul.mubr.msk.f32.vlgmr.msra.gmra.mrb[2].mxu1 %vm187_vm1, %v2196_v59 }
 0x1fe   :  { %1792 = vmatprep.mubr.msk.f32.mxu1 %vm2194_vm0, %v2195_v21 }
 0x2d0   :  { %v348_v33 = vpop.f32.mrb[2].mxu1 }
 0x2d1   :  { %v352_v34 = vmul.f32 0.015625, %v348_v33  ;;  %v1751_v35 = vpop.f32.mrb[3].mxu1 }
 0x2d3   :  { %v353_v36 = vadd.f32 1e-05, %v352_v34 }
 0x2d5   :  { %2043 = vrsqrt.f32 %v353_v36 }
 0x2df   :  { %v2044_v37 = vpop.eup %2043 }
 0x2e0   :  { %v358_v38 = vrot.slane %v2044_v37, %v2299_v0 }
 0x2e2   :  { %v359_v40 = vmul.f32 %v358_v38, %v266_v5  ;;  %v360_v41 = vmul.f32 %v358_v38, %v267_v6  ;;  %v361_v42 = vmul.f32 %v358_v38, %v268_v7  ;;  %v362_v43 = vmul.f32 %v358_v38, %v269_v8  ;;  %v1535_v7 = vld [vmem:[%s2475_s3 + $0x3] ss:$0 sm:$0xff] }
 0x2e3   :  { %v363_v45 = vmul.f32 %v358_v38, %v270_v11  ;;  %v364_v46 = vmul.f32 %v358_v38, %v271_v15  ;;  %v365_v53 = vmul.f32 %v358_v38, %v272_v16  ;;  %v366_v54 = vmul.f32 %v358_v38, %v273_v22 }
 0x2e4   :  { %v371_v47 = vmul.f32 %v1533_v39, %v359_v40  ;;  %v372_v48 = vmul.f32 %v1533_v39, %v360_v41  ;;  %v373_v49 = vmul.f32 %v1533_v39, %v361_v42  ;;  %v374_v50 = vmul.f32 %v1533_v39, %v362_v43 }
 0x2e5   :  { %v375_v51 = vmul.f32 %v1533_v39, %v363_v45  ;;  %v376_v52 = vmul.f32 %v1533_v39, %v364_v46  ;;  %v377_v1 = vmul.f32 %v1533_v39, %v365_v53  ;;  %v378_v2 = vmul.f32 %v1533_v39, %v366_v54  ;;  %v2027_v46 = vld [vmem:[%s2474_s2 + $0x80] sm:$0xff]  }
 0x2e6   :  { %v383_v55 = vadd.f32 %v1534_v44, %v371_v47  ;;  %v384_v56 = vadd.f32 %v1534_v44, %v372_v48  ;;  %v385_v57 = vadd.f32 %v1534_v44, %v373_v49  ;;  %v386_v58 = vadd.f32 %v1534_v44, %v374_v50  ;;  %v2028_v47 = vld [vmem:[%s2474_s2 + $0x88] sm:$0xff]   ;;  %1814 = vmatprep.subr.bf16.mxu0 %v2027_v46 }
 0x2e7   :  { %v387_v60 = vadd.f32 %v1534_v44, %v375_v51  ;;  %v388_v61 = vadd.f32 %v1534_v44, %v376_v52  ;;  %v389_v4 = vadd.f32 %v1534_v44, %v377_v1  ;;  %v390_v5 = vadd.f32 %v1534_v44, %v378_v2 }
 0x2e8   :  { %v410_v62 = vpack.c.bf16 %v384_v56, %v383_v55  ;;  %v411_v63 = vpack.c.bf16 %v386_v58, %v385_v57 }
 0x2e9   :  { %v412_v3 = vpack.c.bf16 %v388_v61, %v387_v60  ;;  %v413_v6 = vpack.c.bf16 %v390_v5, %v389_v4 }
 0x2ea   :  { %1768 = vmatprep.mubr.bf16.mxu0 %v410_v62 }
 0x2eb   :  { %1769 = vmatmul.mubr.bf16.vlgmr.msra.gmra.mrb[8].mxu0 %v411_v63 }
 0x2ec   :  { %1772 = vmatprep.mubr.bf16.mxu0 %v412_v3  ;;  %1815 = vmatpush3.bf16.msra.mxu0 %v2027_v46 }
 0x2ed   :  { %1816 = vmatprep.subr.bf16.mxu0 %v2028_v47 }
 0x2f0   :  { %1817 = vmatpush3.bf16.msra.mxu0 %v2028_v47 }
 0x2f3   :  { %1773 = vmatmul.mubr.bf16.gmra.mrb[12].mxu0 %v413_v6 }
 0x3be   :  { %v1770_v8 = vpop.f32.mrb[8].mxu0 }
 0x3bf   :  { %v500_v9 = vpop.f32.mrb[9].mxu0  ;;  %v509_v14 = vadd.f32 %v1770_v8, %v1535_v7 }
 0x3c0   :  { %v501_v10 = vadd.f32 %v1535_v7, %v500_v9  ;;  %v1771_v11 = vpop.f32.mrb[10].mxu0 }
 0x3c1   :  { %v512_v12 = vadd.f32 %v1771_v11, %v1535_v7  ;;  %v503_v13 = vpop.f32.mrb[11].mxu0  ;;  %v533_v19 = vmul.f32 0.2, %v509_v14  ;;  %v2030_v11 = vld [vmem:[%s2474_s2 + $0x98] sm:$0xff]  }
 0x3c2   :  { %v531_v15 = vmul.f32 0.2, %v501_v10  ;;  %v504_v16 = vadd.f32 %v1535_v7, %v503_v13  ;;  %v2032_v13 = vld [vmem:[%s2474_s2 + $0xa8] sm:$0xff]  }
 0x3c3   :  { %v534_v17 = vmul.f32 0.2, %v512_v12  ;;  %v541_v32 = vmax.f32 %v509_v14, %v533_v19  ;;  %v2033_v14 = vld [vmem:[%s2474_s2 + $0xb0] sm:$0xff]  }
 0x3c4   :  { %v532_v18 = vmul.f32 0.2, %v504_v16  ;;  %v539_v22 = vmax.f32 %v501_v10, %v531_v15  ;;  %v2029_v10 = vld [vmem:[%s2474_s2 + $0x90] sm:$0xff]   ;;  %v2034_v15 = vld [vmem:[%s2474_s2 + $0xb8] sm:$0xff]  }
 0x3c5   :  { %v542_v26 = vmax.f32 %v512_v12, %v534_v17  ;;  %1818 = vmatprep.subr.bf16.mxu0 %v2029_v10  ;;  %v2031_v12 = vld [vmem:[%s2474_s2 + $0xa0] sm:$0xff]  }
 0x3c6   :  { %v540_v23 = vmax.f32 %v504_v16, %v532_v18  ;;  %v1774_v24 = vpop.f32.mrb[12].mxu0  ;;  %1819 = vmatpush3.bf16.msra.mxu0 %v2029_v10 }
 0x3c7   :  { %v516_v25 = vpop.f32.mrb[13].mxu0  ;;  %v525_v33 = vadd.f32 %v1774_v24, %v1535_v7  ;;  %v1947_v36 = vpack.c.bf16 %v542_v26, %v541_v32  ;;  %1820 = vmatprep.subr.bf16.mxu0 %v2030_v11  ;;  %v1546_v24 = vld [vmem:[%s2475_s3 + $0x4] ss:$0 sm:$0xff] }
 0x3c8   :  { %v1944_v27 = vpack.c.bf16 %v540_v23, %v539_v22  ;;  %v517_v28 = vadd.f32 %v1535_v7, %v516_v25  ;;  %v1775_v29 = vpop.f32.mrb[14].mxu0 }
 0x3c9   :  { %v528_v30 = vadd.f32 %v1775_v29, %v1535_v7  ;;  %v519_v31 = vpop.f32.mrb[15].mxu0  ;;  %v537_v39 = vmul.f32 0.2, %v525_v33  ;;  %v1547_v29 = vld [vmem:[%s2475_s3 + $0x5] ss:$0 sm:$0xff] }
 0x3ca   :  { %v535_v34 = vmul.f32 0.2, %v517_v28  ;;  %v520_v35 = vadd.f32 %v1535_v7, %v519_v31  ;;  %1945 = vmatpush3.bf16.msra.mxu1 %v1944_v27  ;;  %1821 = vmatpush3.bf16.msra.mxu0 %v2030_v11 }
 0x3cb   :  { %1946 = vmatprep.subr.bf16.mxu1 %v2193_v20  ;;  %v538_v37 = vmul.f32 0.2, %v528_v30  ;;  %v545_v44 = vmax.f32 %v525_v33, %v537_v39  ;;  %1822 = vmatprep.subr.bf16.mxu0 %v2031_v12 }
 0x3cc   :  { %v536_v38 = vmul.f32 0.2, %v520_v35  ;;  %v543_v40 = vmax.f32 %v517_v28, %v535_v34 }
 0x3cd   :  { %v546_v42 = vmax.f32 %v528_v30, %v538_v37 }
 0x3ce   :  { %v544_v41 = vmax.f32 %v520_v35, %v536_v38  ;;  %1948 = vmatpush3.bf16.msra.mxu1 %v1947_v36  ;;  %1823 = vmatpush3.bf16.msra.mxu0 %v2031_v12 }
 0x3cf   :  { %1949 = vmatprep.subr.bf16.mxu1 %v2193_v20  ;;  %v1953_v45 = vpack.c.bf16 %v546_v42, %v545_v44  ;;  %1824 = vmatprep.subr.bf16.mxu0 %v2032_v13 }
 0x3d0   :  { %v1950_v43 = vpack.c.bf16 %v544_v41, %v543_v40 }
 0x3d2   :  { %1951 = vmatpush3.bf16.msra.mxu1 %v1950_v43  ;;  %1825 = vmatpush3.bf16.msra.mxu0 %v2032_v13 }
 0x3d3   :  { %1952 = vmatprep.subr.bf16.mxu1 %v2193_v20  ;;  %1826 = vmatprep.subr.bf16.mxu0 %v2033_v14 }
 0x3d6   :  { %1954 = vmatpush3.bf16.msra.mxu1 %v1953_v45  ;;  %1827 = vmatpush3.bf16.msra.mxu0 %v2033_v14 }
 0x3d7   :  { %1955 = vmatprep.subr.bf16.mxu1 %v2193_v20  ;;  %1828 = vmatprep.subr.bf16.mxu0 %v2034_v15 }
 0x3d9   :  { %1793 = vmatmul.mubr.msk.f32.vlgmr.msra.gmra.mrb[4].mxu1 %vm187_vm1, %v2196_v59 }
 0x3da   :  { %1811 = vmatprep.mubr.msk.f32.mxu1 %vm2194_vm0, %v2195_v21  ;;  %1829 = vmatpush3.bf16.msra.mxu0 %v2034_v15 }
 0x4ac   :  { %v613_v48 = vpop.f32.mrb[4].mxu1 }
 0x4ad   :  { %v617_v49 = vmul.f32 0.015625, %v613_v48  ;;  %v1794_v50 = vpop.f32.mrb[5].mxu1 }
 0x4af   :  { %v621_v51 = vrot.slane %v617_v49, %v2299_v0 }
 0x4b1   :  { %v622_v52 = vsub.f32 %v539_v22, %v621_v51  ;;  %v623_v53 = vsub.f32 %v540_v23, %v621_v51  ;;  %v624_v54 = vsub.f32 %v541_v32, %v621_v51  ;;  %v625_v55 = vsub.f32 %v542_v26, %v621_v51 }
 0x4b2   :  { %v626_v58 = vsub.f32 %v543_v40, %v621_v51  ;;  %v627_v63 = vsub.f32 %v544_v41, %v621_v51  ;;  %v628_v1 = vsub.f32 %v545_v44, %v621_v51  ;;  %v629_v5 = vsub.f32 %v546_v42, %v621_v51 }
 0x4b3   :  { %v630_v56 = vmul.f32 %v622_v52, %v622_v52  ;;  %v631_v57 = vmul.f32 %v623_v53, %v623_v53  ;;  %v632_v61 = vmul.f32 %v624_v54, %v624_v54  ;;  %v633_v62 = vmul.f32 %v625_v55, %v625_v55 }
 0x4b4   :  { %v634_v3 = vmul.f32 %v626_v58, %v626_v58  ;;  %v635_v4 = vmul.f32 %v627_v63, %v627_v63  ;;  %v636_v7 = vmul.f32 %v628_v1, %v628_v1  ;;  %v637_v8 = vmul.f32 %v629_v5, %v629_v5 }
 0x4b5   :  { %v1956_v60 = vpack.c.bf16 %v631_v57, %v630_v56  ;;  %v1959_v2 = vpack.c.bf16 %v633_v62, %v632_v61 }
 0x4b6   :  { %v1962_v6 = vpack.c.bf16 %v635_v4, %v634_v3  ;;  %v1965_v9 = vpack.c.bf16 %v637_v8, %v636_v7 }
 0x4b7   :  { %1957 = vmatpush3.bf16.msra.mxu1 %v1956_v60 }
 0x4b8   :  { %1958 = vmatprep.subr.bf16.mxu1 %v2193_v20 }
 0x4bb   :  { %1960 = vmatpush3.bf16.msra.mxu1 %v1959_v2 }
 0x4bc   :  { %1961 = vmatprep.subr.bf16.mxu1 %v2193_v20 }
 0x4bf   :  { %1963 = vmatpush3.bf16.msra.mxu1 %v1962_v6 }
 0x4c0   :  { %1964 = vmatprep.subr.bf16.mxu1 %v2193_v20 }
 0x4c3   :  { %1966 = vmatpush3.bf16.msra.mxu1 %v1965_v9 }
 0x4c4   :  { %1967 = vmatprep.subr.bf16.mxu1 %v2193_v20 }
 0x4c6   :  { %1812 = vmatmul.mubr.msk.f32.vlgmr.msra.gmra.mrb[6].mxu1 %vm187_vm1, %v2196_v59 }
 0x4c7   :  { %1854 = vmatprep.mubr.msk.f32.mxu1 %vm2194_vm0, %v2195_v21 }
 0x599   :  { %v704_v16 = vpop.f32.mrb[6].mxu1 }
 0x59a   :  { %v708_v17 = vmul.f32 0.015625, %v704_v16  ;;  %v1813_v18 = vpop.f32.mrb[7].mxu1 }
 0x59c   :  { %v709_v19 = vadd.f32 1e-05, %v708_v17 }
 0x59e   :  { %2045 = vrsqrt.f32 %v709_v19 }
 0x5a8   :  { %v2046_v22 = vpop.eup %2045 }
 0x5a9   :  { %v714_v23 = vrot.slane %v2046_v22, %v2299_v0 }
 0x5ab   :  { %v715_v25 = vmul.f32 %v714_v23, %v622_v52  ;;  %v716_v26 = vmul.f32 %v714_v23, %v623_v53  ;;  %v717_v27 = vmul.f32 %v714_v23, %v624_v54  ;;  %v718_v28 = vmul.f32 %v714_v23, %v625_v55  ;;  %v1548_v54 = vld [vmem:[%s2475_s3 + $0x6] ss:$0 sm:$0xff] }
 0x5ac   :  { %v719_v30 = vmul.f32 %v714_v23, %v626_v58  ;;  %v720_v31 = vmul.f32 %v714_v23, %v627_v63  ;;  %v721_v38 = vmul.f32 %v714_v23, %v628_v1  ;;  %v722_v39 = vmul.f32 %v714_v23, %v629_v5 }
 0x5ad   :  { %v727_v32 = vmul.f32 %v1546_v24, %v715_v25  ;;  %v728_v33 = vmul.f32 %v1546_v24, %v716_v26  ;;  %v729_v34 = vmul.f32 %v1546_v24, %v717_v27  ;;  %v730_v35 = vmul.f32 %v1546_v24, %v718_v28 }
 0x5ae   :  { %v731_v36 = vmul.f32 %v1546_v24, %v719_v30  ;;  %v732_v37 = vmul.f32 %v1546_v24, %v720_v31  ;;  %v733_v48 = vmul.f32 %v1546_v24, %v721_v38  ;;  %v734_v49 = vmul.f32 %v1546_v24, %v722_v39  ;;  %v2035_v31 = vld [vmem:[%s2474_s2 + $0xc0] sm:$0xff]  }
 0x5af   :  { %v739_v40 = vadd.f32 %v1547_v29, %v727_v32  ;;  %v740_v41 = vadd.f32 %v1547_v29, %v728_v33  ;;  %v741_v42 = vadd.f32 %v1547_v29, %v729_v34  ;;  %v742_v43 = vadd.f32 %v1547_v29, %v730_v35  ;;  %v2036_v32 = vld [vmem:[%s2474_s2 + $0xc8] sm:$0xff]   ;;  %1876 = vmatprep.subr.bf16.mxu0 %v2035_v31 }
 0x5b0   :  { %v743_v44 = vadd.f32 %v1547_v29, %v731_v36  ;;  %v744_v45 = vadd.f32 %v1547_v29, %v732_v37  ;;  %v745_v51 = vadd.f32 %v1547_v29, %v733_v48  ;;  %v746_v52 = vadd.f32 %v1547_v29, %v734_v49 }
 0x5b1   :  { %v766_v46 = vpack.c.bf16 %v740_v41, %v739_v40  ;;  %v767_v47 = vpack.c.bf16 %v742_v43, %v741_v42 }
 0x5b2   :  { %v768_v50 = vpack.c.bf16 %v744_v45, %v743_v44  ;;  %v769_v53 = vpack.c.bf16 %v746_v52, %v745_v51 }
 0x5b3   :  { %1830 = vmatprep.mubr.bf16.mxu0 %v766_v46 }
 0x5b4   :  { %1831 = vmatmul.mubr.bf16.vlgmr.msra.gmra.mrb[16].mxu0 %v767_v47 }
 0x5b5   :  { %1834 = vmatprep.mubr.bf16.mxu0 %v768_v50  ;;  %1877 = vmatpush3.bf16.msra.mxu0 %v2035_v31 }
 0x5b6   :  { %1878 = vmatprep.subr.bf16.mxu0 %v2036_v32 }
 0x5b9   :  { %1879 = vmatpush3.bf16.msra.mxu0 %v2036_v32 }
 0x5bc   :  { %1835 = vmatmul.mubr.bf16.gmra.mrb[20].mxu0 %v769_v53 }
 0x687   :  { %v1832_v55 = vpop.f32.mrb[16].mxu0 }
 0x688   :  { %v856_v56 = vpop.f32.mrb[17].mxu0  ;;  %v865_v62 = vadd.f32 %v1832_v55, %v1548_v54 }
 0x689   :  { %v857_v57 = vadd.f32 %v1548_v54, %v856_v56  ;;  %v1833_v58 = vpop.f32.mrb[18].mxu0 }
 0x68a   :  { %v868_v60 = vadd.f32 %v1833_v58, %v1548_v54  ;;  %v859_v61 = vpop.f32.mrb[19].mxu0  ;;  %v889_v4 = vmul.f32 0.2, %v865_v62  ;;  %v2038_v58 = vld [vmem:[%s2474_s2 + $0xd8] sm:$0xff]  }
 0x68b   :  { %v887_v63 = vmul.f32 0.2, %v857_v57  ;;  %v860_v1 = vadd.f32 %v1548_v54, %v859_v61  ;;  %v2041_v61 = vld [vmem:[%s2474_s2 + $0xf0] sm:$0xff]  }
 0x68c   :  { %v890_v2 = vmul.f32 0.2, %v868_v60  ;;  %v897_v15 = vmax.f32 %v865_v62, %v889_v4  ;;  %v2042_v62 = vld [vmem:[%s2474_s2 + $0xf8] sm:$0xff]  }
 0x68d   :  { %v888_v3 = vmul.f32 0.2, %v860_v1  ;;  %v895_v5 = vmax.f32 %v857_v57, %v887_v63  ;;  %v2037_v57 = vld [vmem:[%s2474_s2 + $0xd0] sm:$0xff]  }
 0x68e   :  { %v898_v9 = vmax.f32 %v868_v60, %v890_v2  ;;  %1880 = vmatprep.subr.bf16.mxu0 %v2037_v57  ;;  %v2039_v60 = vld [vmem:[%s2474_s2 + $0xe0] sm:$0xff]  }
 0x68f   :  { %v896_v6 = vmax.f32 %v860_v1, %v888_v3  ;;  %v1836_v7 = vpop.f32.mrb[20].mxu0  ;;  %1881 = vmatpush3.bf16.msra.mxu0 %v2037_v57 }
 0x690   :  { %v872_v8 = vpop.f32.mrb[21].mxu0  ;;  %v881_v16 = vadd.f32 %v1836_v7, %v1548_v54  ;;  %v1971_v19 = vpack.c.bf16 %v898_v9, %v897_v15  ;;  %1882 = vmatprep.subr.bf16.mxu0 %v2038_v58 }
 0x691   :  { %v1968_v10 = vpack.c.bf16 %v896_v6, %v895_v5  ;;  %v873_v11 = vadd.f32 %v1548_v54, %v872_v8  ;;  %v1837_v12 = vpop.f32.mrb[22].mxu0 }
 0x692   :  { %v884_v13 = vadd.f32 %v1837_v12, %v1548_v54  ;;  %v875_v14 = vpop.f32.mrb[23].mxu0  ;;  %v893_v24 = vmul.f32 0.2, %v881_v16 }
 0x693   :  { %v891_v17 = vmul.f32 0.2, %v873_v11  ;;  %v876_v18 = vadd.f32 %v1548_v54, %v875_v14  ;;  %1969 = vmatpush3.bf16.msra.mxu1 %v1968_v10  ;;  %1883 = vmatpush3.bf16.msra.mxu0 %v2038_v58 }
 0x694   :  { %1970 = vmatprep.subr.bf16.mxu1 %v2193_v20  ;;  %v894_v22 = vmul.f32 0.2, %v884_v13  ;;  %v901_v29 = vmax.f32 %v881_v16, %v893_v24  ;;  %1884 = vmatprep.subr.bf16.mxu0 %v2039_v60 }
 0x695   :  { %v892_v23 = vmul.f32 0.2, %v876_v18  ;;  %v899_v25 = vmax.f32 %v873_v11, %v891_v17  ;;  %v1560_v11 = vld [vmem:[%s2475_s3 + $0x8] ss:$0 sm:$0xff] }
 0x696   :  { %v902_v27 = vmax.f32 %v884_v13, %v894_v22 }
 0x697   :  { %v900_v26 = vmax.f32 %v876_v18, %v892_v23  ;;  %1972 = vmatpush3.bf16.msra.mxu1 %v1971_v19  ;;  %1885 = vmatpush3.bf16.msra.mxu0 %v2039_v60 }
 0x698   :  { %1973 = vmatprep.subr.bf16.mxu1 %v2193_v20  ;;  %v1977_v30 = vpack.c.bf16 %v902_v27, %v901_v29 }
 0x699   :  { %v1974_v28 = vpack.c.bf16 %v900_v26, %v899_v25 }
 0x69b   :  { %1975 = vmatpush3.bf16.msra.mxu1 %v1974_v28 }
 0x69c   :  { %1976 = vmatprep.subr.bf16.mxu1 %v2193_v20 }
 0x69f   :  { %1978 = vmatpush3.bf16.msra.mxu1 %v1977_v30 }
 0x6a0   :  { %1979 = vmatprep.subr.bf16.mxu1 %v2193_v20 }
 0x6a2   :  { %1855 = vmatmul.mubr.msk.f32.vlgmr.msra.gmra.mrb[8].mxu1 %vm187_vm1, %v2196_v59 }
 0x6a3   :  { %1873 = vmatprep.mubr.msk.f32.mxu1 %vm2194_vm0, %v2195_v21 }
 0x775   :  { %v969_v33 = vpop.f32.mrb[8].mxu1 }
 0x776   :  { %v973_v34 = vmul.f32 0.015625, %v969_v33  ;;  %v1856_v35 = vpop.f32.mrb[9].mxu1 }
 0x778   :  { %v977_v36 = vrot.slane %v973_v34, %v2299_v0 }
 0x77a   :  { %v978_v37 = vsub.f32 %v895_v5, %v977_v36  ;;  %v979_v38 = vsub.f32 %v896_v6, %v977_v36  ;;  %v980_v39 = vsub.f32 %v897_v15, %v977_v36  ;;  %v981_v40 = vsub.f32 %v898_v9, %v977_v36  ;;  %v1559_v6 = vld [vmem:[%s2475_s3 + $0x7] ss:$0 sm:$0xff] }
 0x77b   :  { %v982_v43 = vsub.f32 %v899_v25, %v977_v36  ;;  %v983_v47 = vsub.f32 %v900_v26, %v977_v36  ;;  %v984_v48 = vsub.f32 %v901_v29, %v977_v36  ;;  %v985_v52 = vsub.f32 %v902_v27, %v977_v36 }
 0x77c   :  { %v986_v41 = vmul.f32 %v978_v37, %v978_v37  ;;  %v987_v42 = vmul.f32 %v979_v38, %v979_v38  ;;  %v988_v45 = vmul.f32 %v980_v39, %v980_v39  ;;  %v989_v46 = vmul.f32 %v981_v40, %v981_v40 }
 0x77d   :  { %v990_v50 = vmul.f32 %v982_v43, %v982_v43  ;;  %v991_v51 = vmul.f32 %v983_v47, %v983_v47  ;;  %v992_v54 = vmul.f32 %v984_v48, %v984_v48  ;;  %v993_v55 = vmul.f32 %v985_v52, %v985_v52 }
 0x77e   :  { %v1980_v44 = vpack.c.bf16 %v987_v42, %v986_v41  ;;  %v1983_v49 = vpack.c.bf16 %v989_v46, %v988_v45 }
 0x77f   :  { %v1986_v53 = vpack.c.bf16 %v991_v51, %v990_v50  ;;  %v1989_v56 = vpack.c.bf16 %v993_v55, %v992_v54 }
 0x780   :  { %1981 = vmatpush3.bf16.msra.mxu1 %v1980_v44 }
 0x781   :  { %1982 = vmatprep.subr.bf16.mxu1 %v2193_v20 }
 0x784   :  { %1984 = vmatpush3.bf16.msra.mxu1 %v1983_v49 }
 0x785   :  { %1985 = vmatprep.subr.bf16.mxu1 %v2193_v20 }
 0x788   :  { %1987 = vmatpush3.bf16.msra.mxu1 %v1986_v53 }
 0x789   :  { %1988 = vmatprep.subr.bf16.mxu1 %v2193_v20 }
 0x78c   :  { %1990 = vmatpush3.bf16.msra.mxu1 %v1989_v56 }
 0x78d   :  { %1991 = vmatprep.subr.bf16.mxu1 %v2193_v20 }
 0x78f   :  { %1874 = vmatmul.mubr.msk.f32.vlgmr.msra.gmra.mrb[10].mxu1 %vm187_vm1, %v2196_v59 }
 0x790   :  { %1916 = vmatprep.mubr.msk.f32.mxu1 %vm2194_vm0, %v2195_v21  ;;  %v2040_v21 = vld [vmem:[%s2474_s2 + $0xe8] sm:$0xff]  }
 0x791   :  { %1886 = vmatprep.subr.bf16.mxu0 %v2040_v21 }
 0x792   :  { %1887 = vmatpush3.bf16.msra.mxu0 %v2040_v21 }
 0x793   :  { %1888 = vmatprep.subr.bf16.mxu0 %v2041_v61 }
 0x796   :  { %1889 = vmatpush3.bf16.msra.mxu0 %v2041_v61 }
 0x797   :  { %1890 = vmatprep.subr.bf16.mxu0 %v2042_v62 }
 0x79a   :  { %1891 = vmatpush3.bf16.msra.mxu0 %v2042_v62 }
 0x862   :  { %v1060_v63 = vpop.f32.mrb[10].mxu1 }
 0x863   :  { %v1064_v1 = vmul.f32 0.015625, %v1060_v63  ;;  %v1875_v2 = vpop.f32.mrb[11].mxu1 }
 0x865   :  { %v1065_v3 = vadd.f32 1e-05, %v1064_v1 }
 0x867   :  { %2047 = vrsqrt.f32 %v1065_v3 }
 0x871   :  { %v2048_v4 = vpop.eup %2047 }
 0x872   :  { %v1070_v5 = vrot.slane %v2048_v4, %v2299_v0 }
 0x874   :  { %v1071_v7 = vmul.f32 %v1070_v5, %v978_v37  ;;  %v1072_v8 = vmul.f32 %v1070_v5, %v979_v38  ;;  %v1073_v9 = vmul.f32 %v1070_v5, %v980_v39  ;;  %v1074_v10 = vmul.f32 %v1070_v5, %v981_v40  ;;  %v1561_v37 = vld [vmem:[%s2475_s3 + $0x9] ss:$0 sm:$0xff] }
 0x875   :  { %v1075_v12 = vmul.f32 %v1070_v5, %v982_v43  ;;  %v1076_v13 = vmul.f32 %v1070_v5, %v983_v47  ;;  %v1077_v19 = vmul.f32 %v1070_v5, %v984_v48  ;;  %v1078_v22 = vmul.f32 %v1070_v5, %v985_v52 }
 0x876   :  { %v1083_v14 = vmul.f32 %v1559_v6, %v1071_v7  ;;  %v1084_v15 = vmul.f32 %v1559_v6, %v1072_v8  ;;  %v1085_v16 = vmul.f32 %v1559_v6, %v1073_v9  ;;  %v1086_v17 = vmul.f32 %v1559_v6, %v1074_v10 }
 0x877   :  { %v1087_v18 = vmul.f32 %v1559_v6, %v1075_v12  ;;  %v1088_v0 = vmul.f32 %v1559_v6, %v1076_v13  ;;  %v1089_v31 = vmul.f32 %v1559_v6, %v1077_v19  ;;  %v1090_v32 = vmul.f32 %v1559_v6, %v1078_v22 }
 0x878   :  { %v1095_v23 = vadd.f32 %v1560_v11, %v1083_v14  ;;  %v1096_v24 = vadd.f32 %v1560_v11, %v1084_v15  ;;  %v1097_v25 = vadd.f32 %v1560_v11, %v1085_v16  ;;  %v1098_v26 = vadd.f32 %v1560_v11, %v1086_v17 }
 0x879   :  { %v1099_v27 = vadd.f32 %v1560_v11, %v1087_v18  ;;  %v1100_v28 = vadd.f32 %v1560_v11, %v1088_v0  ;;  %v1101_v34 = vadd.f32 %v1560_v11, %v1089_v31  ;;  %v1102_v35 = vadd.f32 %v1560_v11, %v1090_v32 }
 0x87a   :  { %v1120_v29 = vpack.c.bf16 %v1096_v24, %v1095_v23  ;;  %v1121_v30 = vpack.c.bf16 %v1098_v26, %v1097_v25 }
 0x87b   :  { %v1122_v33 = vpack.c.bf16 %v1100_v28, %v1099_v27  ;;  %v1123_v36 = vpack.c.bf16 %v1102_v35, %v1101_v34 }
 0x87c   :  { %1892 = vmatprep.mubr.bf16.mxu0 %v1120_v29 }
 0x87d   :  { %1893 = vmatmul.mubr.bf16.vlgmr.msra.gmra.mrb[24].mxu0 %v1121_v30 }
 0x87e   :  { %1896 = vmatprep.mubr.bf16.mxu0 %v1122_v33 }
 0x885   :  { %1897 = vmatmul.mubr.bf16.gmra.mrb[28].mxu0 %v1123_v36 }
 0x950   :  { %v1894_v38 = vpop.f32.mrb[24].mxu0 }
 0x951   :  { %v1219_v39 = vadd.f32 %v1894_v38, %v1561_v37  ;;  %v1210_v40 = vpop.f32.mrb[25].mxu0 }
 0x952   :  { %v1211_v41 = vadd.f32 %v1561_v37, %v1210_v40  ;;  %v1895_v42 = vpop.f32.mrb[26].mxu0 }
 0x953   :  { %v1315_v43 = vmul.f32 0.5, %v1219_v39  ;;  %v1222_v44 = vadd.f32 %v1895_v42, %v1561_v37  ;;  %v1213_v45 = vpop.f32.mrb[27].mxu0 }
 0x954   :  { %v1313_v46 = vmul.f32 0.5, %v1211_v41  ;;  %v1214_v47 = vadd.f32 %v1561_v37, %v1213_v45 }
 0x955   :  { %2049 = vtanh.f32 %v1315_v43  ;;  %v1995_v48 = vpack.c.bf16 %v1222_v44, %v1219_v39  ;;  %v1316_v49 = vmul.f32 0.5, %v1222_v44 }
 0x956   :  { %2051 = vtanh.f32 %v1313_v46  ;;  %v1992_v50 = vpack.c.bf16 %v1214_v47, %v1211_v41  ;;  %v1314_v51 = vmul.f32 0.5, %v1214_v47 }
 0x957   :  { %2053 = vtanh.f32 %v1316_v49 }
 0x958   :  { %2055 = vtanh.f32 %v1314_v51  ;;  %v1898_v52 = vpop.f32.mrb[28].mxu0  ;;  %1993 = vmatpush3.bf16.msra.mxu1 %v1992_v50 }
 0x959   :  { %v1235_v53 = vadd.f32 %v1898_v52, %v1561_v37  ;;  %v1226_v54 = vpop.f32.mrb[29].mxu0  ;;  %1994 = vmatprep.subr.bf16.mxu1 %v2193_v20 }
 0x95a   :  { %v1227_v55 = vadd.f32 %v1561_v37, %v1226_v54  ;;  %v1899_v56 = vpop.f32.mrb[30].mxu0 }
 0x95b   :  { %v1319_v57 = vmul.f32 0.5, %v1235_v53  ;;  %v1238_v58 = vadd.f32 %v1899_v56, %v1561_v37  ;;  %v1229_v60 = vpop.f32.mrb[31].mxu0 }
 0x95c   :  { %v1317_v21 = vmul.f32 0.5, %v1227_v55  ;;  %v1230_v61 = vadd.f32 %v1561_v37, %v1229_v60  ;;  %1996 = vmatpush3.bf16.msra.mxu1 %v1995_v48 }
 0x95d   :  { %2057 = vtanh.f32 %v1319_v57  ;;  %v2001_v62 = vpack.c.bf16 %v1238_v58, %v1235_v53  ;;  %v1320_v63 = vmul.f32 0.5, %v1238_v58  ;;  %1997 = vmatprep.subr.bf16.mxu1 %v2193_v20 }
 0x95e   :  { %2059 = vtanh.f32 %v1317_v21  ;;  %v1998_v1 = vpack.c.bf16 %v1230_v61, %v1227_v55  ;;  %v1318_v2 = vmul.f32 0.5, %v1230_v61 }
 0x95f   :  { %v2050_v3 = vpop.eup %2049  ;;  %2061 = vtanh.f32 %v1320_v63 }
 0x960   :  { %v2052_v4 = vpop.eup %2051  ;;  %v1331_v5 = vmul.f32 0.5, %v2050_v3  ;;  %2063 = vtanh.f32 %v1318_v2  ;;  %1999 = vmatpush3.bf16.msra.mxu1 %v1998_v1 }
 0x961   :  { %v2054_v6 = vpop.eup %2053  ;;  %v1329_v7 = vmul.f32 0.5, %v2052_v4  ;;  %2000 = vmatprep.subr.bf16.mxu1 %v2193_v20 }
 0x962   :  { %v2056_v8 = vpop.eup %2055  ;;  %v1339_v9 = vadd.f32 0.5, %v1331_v5  ;;  %v1332_v10 = vmul.f32 0.5, %v2054_v6 }
 0x963   :  { %v1337_v11 = vadd.f32 0.5, %v1329_v7  ;;  %v1330_v12 = vmul.f32 0.5, %v2056_v8 }
 0x964   :  { %v1349_v13 = vmul.f32 1.442695, %v1339_v9  ;;  %v1340_v14 = vadd.f32 0.5, %v1332_v10  ;;  %2002 = vmatpush3.bf16.msra.mxu1 %v2001_v62 }
 0x965   :  { %v1345_v15 = vmul.f32 1.442695, %v1337_v11  ;;  %v1338_v16 = vadd.f32 0.5, %v1330_v12 }
 0x966   :  { %2065 = vpow2.f32 %v1349_v13  ;;  %v1351_v17 = vmul.f32 1.442695, %v1340_v14 }
 0x967   :  { %v2058_v18 = vpop.eup %2057  ;;  %2067 = vpow2.f32 %v1345_v15  ;;  %v1347_v0 = vmul.f32 1.442695, %v1338_v16  ;;  %1917 = vmatmul.mubr.msk.f32.vlgmr.msra.gmra.mrb[12].mxu1 %vm187_vm1, %v2196_v59 }
 0x968   :  { %v2060_v19 = vpop.eup %2059  ;;  %v1335_v20 = vmul.f32 0.5, %v2058_v18  ;;  %2069 = vpow2.f32 %v1351_v17 }
 0x969   :  { %v2062_v22 = vpop.eup %2061  ;;  %v1333_v23 = vmul.f32 0.5, %v2060_v19  ;;  %2071 = vpow2.f32 %v1347_v0 }
 0x96a   :  { %v2064_v24 = vpop.eup %2063  ;;  %v1336_v25 = vmul.f32 0.5, %v2062_v22  ;;  %v1343_v26 = vadd.f32 0.5, %v1335_v20 }
 0x96b   :  { %v1341_v27 = vadd.f32 0.5, %v1333_v23  ;;  %v1334_v28 = vmul.f32 0.5, %v2064_v24 }
 0x96c   :  { %v1344_v30 = vadd.f32 0.5, %v1336_v25  ;;  %v1357_v32 = vmul.f32 1.442695, %v1343_v26 }
 0x96d   :  { %v1353_v29 = vmul.f32 1.442695, %v1341_v27  ;;  %v1342_v31 = vadd.f32 0.5, %v1334_v28 }
 0x96e   :  { %v1359_v59 = vmul.f32 1.442695, %v1344_v30 }
 0x96f   :  { %2073 = vpow2.f32 %v1353_v29  ;;  %v1355_v33 = vmul.f32 1.442695, %v1342_v31 }
 0x970   :  { %v2066_v34 = vpop.eup %2065 }
 0x971   :  { %v2068_v35 = vpop.eup %2067  ;;  %2075 = vpow2.f32 %v1355_v33  ;;  %1365 = vadd.xlane.f32.xlu1 %v2066_v34 }
 0x972   :  { %1361 = vadd.xlane.f32.xlu0 %v2068_v35  ;;  %2077 = vpow2.f32 %v1357_v32  ;;  %v2070_v36 = vpop.eup %2069 }
 0x973   :  { %v2072_v37 = vpop.eup %2071  ;;  %2079 = vpow2.f32 %v1359_v59 }
 0x975   :  { %1367 = vadd.xlane.f32.xlu1 %v2070_v36 }
 0x976   :  { %1363 = vadd.xlane.f32.xlu0 %v2072_v37 }
 0x979   :  { %v2074_v38 = vpop.eup %2073 }
 0x97a   :  { %1369 = vadd.xlane.f32.xlu0 %v2074_v38 }
 0x97b   :  { %v2076_v39 = vpop.eup %2075 }
 0x97c   :  { %1371 = vadd.xlane.f32.xlu1 %v2076_v39  ;;  %v2078_v40 = vpop.eup %2077 }
 0x97d   :  { %v2080_v41 = vpop.eup %2079 }
 0x97e   :  { %1373 = vadd.xlane.f32.xlu0 %v2078_v40 }
 0x980   :  { %1375 = vadd.xlane.f32.xlu1 %v2080_v41 }
 0x9fe   :  { %v1366_v42 = vpop.xlane.xlu1 %1365 }
 0x9ff   :  { %2081 = vrcp.f32 %v1366_v42  ;;  %v1362_v43 = vpop.xlane.xlu0 %1361 }
 0xa00   :  { %2083 = vrcp.f32 %v1362_v43 }
 0xa02   :  { %v1368_v44 = vpop.xlane.xlu1 %1367 }
 0xa03   :  { %2085 = vrcp.f32 %v1368_v44  ;;  %v1364_v45 = vpop.xlane.xlu0 %1363 }
 0xa04   :  { %2087 = vrcp.f32 %v1364_v45 }
 0xa07   :  { %v1370_v46 = vpop.xlane.xlu0 %1369 }
 0xa08   :  { %2089 = vrcp.f32 %v1370_v46 }
 0xa09   :  { %v2082_v47 = vpop.eup %2081  ;;  %v1372_v48 = vpop.xlane.xlu1 %1371 }
 0xa0a   :  { %v2084_v49 = vpop.eup %2083  ;;  %v1387_v50 = vmul.f32 %v2082_v47, %v2066_v34  ;;  %2091 = vrcp.f32 %v1372_v48  ;;  %v1459_v47 = vstv %s1410_s15 }
 0xa0b   :  { %v1385_v51 = vmul.f32 %v2084_v49, %v2068_v35  ;;  %v1374_v52 = vpop.xlane.xlu0 %1373 }
 0xa0c   :  { %v1395_v53 = vmul.f32 100.0, %v1387_v50  ;;  %2093 = vrcp.f32 %v1374_v52 }
 0xa0d   :  { %v2086_v54 = vpop.eup %2085  ;;  %v1393_v55 = vmul.f32 100.0, %v1385_v51  ;;  %v1376_v56 = vpop.xlane.xlu1 %1375 }
 0xa0e   :  { %v2088_v57 = vpop.eup %2087  ;;  %v1573_v58 = vadd.f32 -0.78125, %v1395_v53  ;;  %v1388_v60 = vmul.f32 %v2086_v54, %v2070_v36  ;;  %2095 = vrcp.f32 %v1376_v56 }
 0xa0f   :  { %v1571_v21 = vadd.f32 -0.78125, %v1393_v55  ;;  %v1386_v61 = vmul.f32 %v2088_v57, %v2072_v37 }
 0xa10   :  { %v1413_v62 = vsub.f32 0.0, %v1573_v58  ;;  %v1396_v63 = vmul.f32 100.0, %v1388_v60 }
 0xa11   :  { %v1411_v1 = vsub.f32 0.0, %v1571_v21  ;;  %v1394_v2 = vmul.f32 100.0, %v1386_v61 }
 0xa12   :  { %v2090_v3 = vpop.eup %2089  ;;  %v1423_v4 = vmul.f32 1.442695, %v1413_v62  ;;  %v1574_v5 = vadd.f32 -0.78125, %v1396_v63 }
 0xa13   :  { %v1419_v6 = vmul.f32 1.442695, %v1411_v1  ;;  %v1572_v7 = vadd.f32 -0.78125, %v1394_v2  ;;  %v1389_v8 = vmul.f32 %v2090_v3, %v2074_v38 }
 0xa14   :  { %v2092_v9 = vpop.eup %2091  ;;  %2097 = vpow2.f32 %v1423_v4  ;;  %v1414_v10 = vsub.f32 0.0, %v1574_v5 }
 0xa15   :  { %2099 = vpow2.f32 %v1419_v6  ;;  %v1412_v11 = vsub.f32 0.0, %v1572_v7  ;;  %v1397_v12 = vmul.f32 100.0, %v1389_v8  ;;  %v1390_v13 = vmul.f32 %v2092_v9, %v2076_v39 }
 0xa16   :  { %v2094_v14 = vpop.eup %2093  ;;  %v1425_v15 = vmul.f32 1.442695, %v1414_v10 }
 0xa17   :  { %v1421_v16 = vmul.f32 1.442695, %v1412_v11  ;;  %v1575_v17 = vadd.f32 -0.78125, %v1397_v12  ;;  %v1398_v18 = vmul.f32 100.0, %v1390_v13  ;;  %v1391_v0 = vmul.f32 %v2094_v14, %v2078_v40 }
 0xa18   :  { %v2096_v19 = vpop.eup %2095  ;;  %2101 = vpow2.f32 %v1425_v15 }
 0xa19   :  { %2103 = vpow2.f32 %v1421_v16  ;;  %v1415_v20 = vsub.f32 0.0, %v1575_v17  ;;  %v1576_v22 = vadd.f32 -0.78125, %v1398_v18  ;;  %v1399_v23 = vmul.f32 100.0, %v1391_v0 }
 0xa1a   :  { %v1392_v24 = vmul.f32 %v2096_v19, %v2080_v41 }
 0xa1b   :  { %v1427_v25 = vmul.f32 1.442695, %v1415_v20  ;;  %v1416_v26 = vsub.f32 0.0, %v1576_v22  ;;  %v1577_v27 = vadd.f32 -0.78125, %v1399_v23 }
 0xa1c   :  { %v1400_v28 = vmul.f32 100.0, %v1392_v24 }
 0xa1d   :  { %2105 = vpow2.f32 %v1427_v25  ;;  %v1429_v29 = vmul.f32 1.442695, %v1416_v26  ;;  %v1417_v30 = vsub.f32 0.0, %v1577_v27 }
 0xa1e   :  { %v2098_v31 = vpop.eup %2097  ;;  %v1578_v32 = vadd.f32 -0.78125, %v1400_v28 }
 0xa1f   :  { %v2100_v33 = vpop.eup %2099  ;;  %v1437_v34 = vadd.f32 1.0, %v2098_v31  ;;  %2107 = vpow2.f32 %v1429_v29  ;;  %v1431_v35 = vmul.f32 1.442695, %v1417_v30 }
 0xa20   :  { %v1435_v59 = vadd.f32 1.0, %v2100_v33  ;;  %v1418_v36 = vsub.f32 0.0, %v1578_v32 }
 0xa21   :  { %2109 = vlog2.f32 %v1437_v34 }
 0xa22   :  { %v2102_v37 = vpop.eup %2101  ;;  %2111 = vlog2.f32 %v1435_v59  ;;  %v1433_v38 = vmul.f32 1.442695, %v1418_v36 }
 0xa23   :  { %v2104_v39 = vpop.eup %2103  ;;  %v1438_v40 = vadd.f32 1.0, %v2102_v37  ;;  %2113 = vpow2.f32 %v1431_v35 }
 0xa24   :  { %v1436_v41 = vadd.f32 1.0, %v2104_v39  ;;  %2115 = vpow2.f32 %v1433_v38 }
 0xa25   :  { %2117 = vlog2.f32 %v1438_v40 }
 0xa26   :  { %2119 = vlog2.f32 %v1436_v41 }
 0xa27   :  { %v2106_v42 = vpop.eup %2105 }
 0xa28   :  { %v1439_v43 = vadd.f32 1.0, %v2106_v42 }
 0xa29   :  { %v2108_v44 = vpop.eup %2107 }
 0xa2a   :  { %2121 = vlog2.f32 %v1439_v43  ;;  %v1440_v45 = vadd.f32 1.0, %v2108_v44 }
 0xa2b   :  { %v2110_v46 = vpop.eup %2109 }
 0xa2c   :  { %v2112_v48 = vpop.eup %2111  ;;  %v1448_v49 = vmul.f32 0.6931472, %v2110_v46  ;;  %2123 = vlog2.f32 %v1440_v45 }
 0xa2d   :  { %v2114_v50 = vpop.eup %2113  ;;  %v1444_v51 = vmul.f32 0.6931472, %v2112_v48 }
 0xa2e   :  { %v2116_v52 = vpop.eup %2115  ;;  %v1462_v53 = vmul.f32 %v1459_v47, %v1448_v49  ;;  %v1441_v54 = vadd.f32 1.0, %v2114_v50 }
 0xa2f   :  { %v2118_v55 = vpop.eup %2117  ;;  %v1460_v56 = vmul.f32 %v1459_v47, %v1444_v51  ;;  %v1442_v57 = vadd.f32 1.0, %v2116_v52 }
 0xa30   :  { %v2120_v58 = vpop.eup %2119  ;;  %v1472_v60 = vmul.f32 1.442695, %v1462_v53  ;;  %v1450_v21 = vmul.f32 0.6931472, %v2118_v55  ;;  %2125 = vlog2.f32 %v1441_v54 }
 0xa31   :  { %v1468_v61 = vmul.f32 1.442695, %v1460_v56  ;;  %v1446_v62 = vmul.f32 0.6931472, %v2120_v58  ;;  %2127 = vlog2.f32 %v1442_v57 }
 0xa32   :  { %2129 = vpow2.f32 %v1472_v60  ;;  %v1463_v63 = vmul.f32 %v1459_v47, %v1450_v21 }
 0xa33   :  { %2131 = vpow2.f32 %v1468_v61  ;;  %v1461_v1 = vmul.f32 %v1459_v47, %v1446_v62 }
 0xa34   :  { %v2122_v2 = vpop.eup %2121  ;;  %v1474_v3 = vmul.f32 1.442695, %v1463_v63 }
 0xa35   :  { %v1470_v4 = vmul.f32 1.442695, %v1461_v1  ;;  %v1452_v5 = vmul.f32 0.6931472, %v2122_v2 }
 0xa36   :  { %v2124_v6 = vpop.eup %2123  ;;  %2133 = vpow2.f32 %v1474_v3 }
 0xa37   :  { %2135 = vpow2.f32 %v1470_v4  ;;  %v1464_v7 = vmul.f32 %v1459_v47, %v1452_v5  ;;  %v1454_v8 = vmul.f32 0.6931472, %v2124_v6 }
 0xa39   :  { %v1476_v9 = vmul.f32 1.442695, %v1464_v7  ;;  %v1465_v10 = vmul.f32 %v1459_v47, %v1454_v8 }
 0xa3a   :  { %v2126_v11 = vpop.eup %2125  ;;  %v1307_v12 = vpop.f32.mrb[12].mxu1 }
 0xa3b   :  { %v2128_v13 = vpop.eup %2127  ;;  %2137 = vpow2.f32 %v1476_v9  ;;  %v1478_v14 = vmul.f32 1.442695, %v1465_v10  ;;  %v1456_v15 = vmul.f32 0.6931472, %v2126_v11  ;;  %v1311_v16 = vmul.f32 0.015625, %v1307_v12  ;;  %v1918_v17 = vpop.f32.mrb[13].mxu1 }
 0xa3c   :  { %v2130_v18 = vpop.eup %2129  ;;  %v1458_v0 = vmul.f32 0.6931472, %v2128_v13 }
 0xa3d   :  { %v2132_v19 = vpop.eup %2131  ;;  %1486 = vst [vmem:[#allocation3 + $0x10] sm:$0xff] %v2130_v18  ;;  %2139 = vpow2.f32 %v1478_v14  ;;  %v1466_v20 = vmul.f32 %v1459_v47, %v1456_v15  ;;  %1312 = vst [vmem:[#allocation5] sm:$0x1] %v1311_v16 }
 0xa3e   :  { %1484 = vst [vmem:[#allocation3] sm:$0xff] %v2132_v19  ;;  %v1467_v22 = vmul.f32 %v1459_v47, %v1458_v0 }
 0xa3f   :  { %2156 = shalt.err (!%p2153_p4)
}
 0xa40   :  { %s2157_s21 = scalar_lea.hbm %s2477_s5, 16 }
 0xa41   :  { %p2158_p5 = scmp.ne.s32.totalorder %s2477_s5, %s2157_s21  ;;  %p2161_p6 = scmp.lt.u32.totalorder %s2157_s21, %s2477_s5 }
 0xa43   :  { %p2163_p7 = pnand %p2161_p6, %p2158_p5 }
 0xa45   :  { %2166 = shalt.err (!%p2163_p7)
}
 0xa46   :  { %1513 = dma.vmem_to_hbm [thread:$0]  %s1511_s16, 16, %s2477_s5, [#allocation6]   ;;  %v1480_v23 = vmul.f32 1.442695, %v1466_v20  ;;  %v2134_v24 = vpop.eup %2133  ;;  %v1482_v25 = vmul.f32 1.442695, %v1467_v22 }
 0xa47   :  { %v2136_v26 = vpop.eup %2135  ;;  %1487 = vst [vmem:[#allocation3 + $0x18] sm:$0xff] %v2134_v24  ;;  %s2198_s27 = smov [#allocation3]  }
 0xa48   :  { %2141 = vpow2.f32 %v1480_v23  ;;  %1485 = vst [vmem:[#allocation3 + $0x8] sm:$0xff] %v2136_v26  ;;  %v2138_v27 = vpop.eup %2137  ;;  %s1497_s28 = sshll.u32 %s2198_s27, 4  ;;  %s1498_s28 = int_to_ptr.vmem [resolvable:$true] %s1497_s28 }
 0xa49   :  { %2143 = vpow2.f32 %v1482_v25  ;;  %1488 = vst [vmem:[#allocation3 + $0x20] sm:$0xff] %v2138_v27  ;;  %v2140_v28 = vpop.eup %2139  ;;  %s2167_s5 = scalar_lea.vmem %s1498_s28, 1024  ;;  %p2172_p9 = scmp.lt.s32.totalorder %s1498_s28, %s1498_s28 }
 0xa4a   :  { %1489 = vst [vmem:[#allocation3 + $0x28] sm:$0xff] %v2140_v28  ;;  %p2168_p8 = scmp.ne.s32.totalorder %s1498_s28, %s2167_s5  ;;  %p2173_p10 = scmp.lt.s32.totalorder %s2167_s5, %s2167_s5 }
 0xa4c   :  { %p2174_p11 = por %p2173_p10, %p2172_p9 }
 0xa4e   :  { %p2175_p12 = pnand %p2174_p11, %p2168_p8 }
 0xa52   :  { %v2142_v29 = vpop.eup %2141 }
 0xa53   :  { %v2144_v30 = vpop.eup %2143  ;;  %1490 = vst [vmem:[#allocation3 + $0x30] sm:$0xff] %v2142_v29 }
 0xa54   :  { %1491 = vst [vmem:[#allocation3 + $0x38] sm:$0xff] %v2144_v30 }
 0xa55   :  { %2178 = shalt.err (!%p2175_p12)
}
 0xa56   :  { %s2179_s6 = scalar_lea.hbm %s2476_s4, 1024 }
 0xa57   :  { %p2180_p13 = scmp.ne.s32.totalorder %s2476_s4, %s2179_s6  ;;  %p2183_p0 = scmp.lt.u32.totalorder %s2179_s6, %s2476_s4 }
 0xa59   :  { %p2185_p1 = pnand %p2183_p0, %p2180_p13 }
 0xa5b   :  { %2188 = shalt.err (!%p2185_p1)
}
 0xa5c   :  { %s2199_s2 = smov 128   ;;  %s2200_s11 = smov 8  }
 0xa5d   :  { %1503 = dma.vmem_to_hbm [thread:$0]  %s1498_s28, 1024, %s2476_s4, [#allocation4], %s2199_s2, %s2199_s2, %s2200_s11  }
 0xa5e   :  { %2189 = dma.done.wait [#allocation4], 1024  }
 0xa5f   :  { %2190 = vsyncadd [#allocation4], 4294966272 }
 0xa60   :  { %2191 = dma.done.wait [#allocation6], 16  }
 0xa61   :  { %2192 = vsyncadd [#allocation6], 4294967280 }
 0xa62   :  { %1520 = vsyncpa [#allocation4], 1 }
 0xa63   :  { %1521 = vsyncpa [#allocation6], 1 }

</bundles_post_ra>
